<compile_context>
chip_gen: v7x
topology: tpu7x:2x2x1
jax: 0.10.0
libtpu: 0.0.40
codegen_flags: <defaults>
</compile_context>

<pallas_src>
import jax
import jax.numpy as jnp
from jax.experimental import pallas as pl
from jax.experimental.pallas import tpu as pltpu


def _mlp_kernel(x_ref, w_hbm_ref, g_ref, b_ref, o_ref, w_buf, sem):
    num_layers = w_hbm_ref.shape[0]
    n = x_ref.shape[0]
    inv_n = jnp.float32(1.0 / n)
    eps = jnp.float32(1e-5)

    # Prime the weight pipeline: DMA W[0] into slot 0.
    pltpu.make_async_copy(w_hbm_ref.at[0], w_buf.at[0], sem.at[0]).start()

    def single_layer(l, h):
        slot = l % 2
        # Wait for this layer's weights ...
        pltpu.make_async_copy(w_hbm_ref.at[l], w_buf.at[slot], sem.at[slot]).wait()

        # ... and prefetch the next layer's weights into the spare slot while we compute.
        @pl.when(l + 1 < num_layers)
        def _():
            pltpu.make_async_copy(
                w_hbm_ref.at[l + 1], w_buf.at[1 - slot], sem.at[1 - slot]
            ).start()

        w = w_buf[slot]  # (C_pad, C_pad) bf16, already transposed so y = h @ W^T

        # Linear (no bias): bf16 operands on the MXU, f32 accumulation.
        y = jnp.dot(h.astype(jnp.bfloat16), w, preferred_element_type=jnp.float32)

        # BatchNorm1d (training mode): one-pass batch statistics per feature, f32.
        mean = jnp.sum(y, axis=0, keepdims=True) * inv_n
        mean_sq = jnp.sum(y * y, axis=0, keepdims=True) * inv_n
        var = jnp.maximum(mean_sq - mean * mean, 0.0)  # biased variance

        # Folded affine: only mul + add + max remain on the (N, C_pad) path.
        scale = g_ref[l] * jax.lax.rsqrt(var + eps)  # (1, C_pad)
        shift = b_ref[l] - mean * scale              # (1, C_pad)

        # ReLU fused with the scale/shift.
        return jnp.maximum(y * scale + shift, 0.0)

    h0 = x_ref[...].astype(jnp.float32)

    # Manual unroll-by-2 (gives the scheduler two layers of visibility, safe vreg use).
    def body2(i, h):
        h = single_layer(2 * i, h)
        return single_layer(2 * i + 1, h)

    h = jax.lax.fori_loop(0, num_layers // 2, body2, h0)
    if num_layers % 2:  # static tail for odd layer counts
        h = single_layer(num_layers - 1, h)

    o_ref[...] = h.astype(o_ref.dtype)


def prepare_mlp_params(weights, gammas, betas):
    """One-time parameter preparation (hoisted out of the per-call path).

    weights: (L, C, C) f32 in PyTorch layout (y = x @ W.T)
    gammas/betas: (L, C) f32 (BatchNorm1d affine params)
    Returns padded/transposed/cast device buffers reused by every forward call.
    """
    layers, c_out, c_in = weights.shape
    assert c_out == c_in, "square Linear layers expected"
    c = c_in
    c_pad = pl.cdiv(c, 128) * 128  # lane-dense feature dim

    w_t = jnp.transpose(weights, (0, 2, 1)).astype(jnp.bfloat16)  # (L, C_in, C_out)
    w_p = (
        jnp.zeros((layers, c_pad, c_pad), jnp.bfloat16).at[:, :c, :c].set(w_t)
    )
    g_p = jnp.ones((layers, 1, c_pad), jnp.float32).at[:, 0, :c].set(gammas)
    b_p = jnp.zeros((layers, 1, c_pad), jnp.float32).at[:, 0, :c].set(betas)
    return w_p, g_p, b_p


@jax.jit
def mlp_forward_padded(x, w_p, g_p, b_p):
    """x: (N, C) f32; w_p/g_p/b_p from prepare_mlp_params (padded to C_pad)."""
    n, c = x.shape
    c_pad = w_p.shape[-1]

    # Per-call input padding only (tiny); padded columns stay exactly zero.
    x_p = jnp.zeros((n, c_pad), jnp.float32).at[:, :c].set(x.astype(jnp.float32))

    out_p = pl.pallas_call(
        _mlp_kernel,
        out_shape=jax.ShapeDtypeStruct((n, c_pad), x.dtype),
        in_specs=[
            pl.BlockSpec(memory_space=pltpu.MemorySpace.VMEM),  # x (resident)
            pl.BlockSpec(memory_space=pl.ANY),                  # weights, streamed from HBM
            pl.BlockSpec(memory_space=pltpu.MemorySpace.VMEM),  # gammas
            pl.BlockSpec(memory_space=pltpu.MemorySpace.VMEM),  # betas
        ],
        out_specs=pl.BlockSpec(memory_space=pltpu.MemorySpace.VMEM),
        scratch_shapes=[
            pltpu.VMEM((2, c_pad, c_pad), jnp.bfloat16),  # double-buffered weight tile
            pltpu.SemaphoreType.DMA((2,)),                # one DMA sem per slot
        ],
        compiler_params=pltpu.CompilerParams(
            vmem_limit_bytes=32 * 1024 * 1024,
        ),
    )(x_p, w_p, g_p, b_p)

    return out_p[:, :c]


def mlp_forward(x, weights, gammas, betas):
    """Convenience wrapper; prefer prepare_mlp_params() once + mlp_forward_padded()."""
    w_p, g_p, b_p = prepare_mlp_params(weights, gammas, betas)
    return mlp_forward_padded(x, w_p, g_p, b_p)


if __name__ == "__main__":
    # Small, deterministic setup consistent with MLP(neural_num, layers=100)
    neural_num = 32
    layers = 100
    batch = 16

    key = jax.random.PRNGKey(0)
    kx, kw = jax.random.split(key)

    # Input: (batch, neural_num), like the torch input to nn.Linear/BatchNorm1d
    x = jax.random.normal(kx, (batch, neural_num), dtype=jnp.float32)

    # Kaiming-normal init per Linear weight (fan_in = neural_num, gain = sqrt(2))
    std = (2.0 / neural_num) ** 0.5
    weights = std * jax.random.normal(
        kw, (layers, neural_num, neural_num), dtype=jnp.float32
    )

    # BatchNorm1d default affine init: gamma = 1, beta = 0
    gammas = jnp.ones((layers, neural_num), dtype=jnp.float32)
    betas = jnp.zeros((layers, neural_num), dtype=jnp.float32)

    # One-time parameter prep (padding/transpose/cast hoisted out of the forward).
    w_p, g_p, b_p = prepare_mlp_params(weights, gammas, betas)

    out = mlp_forward_padded(x, w_p, g_p, b_p)
    jax.block_until_ready(out)

    # sanity: finite output of the right shape
    assert out.shape == (batch, neural_num)
    assert bool(jnp.all(jnp.isfinite(out)))
    print("KERNEL_OK")
</pallas_src>

<mosaic_0001>
module attributes {stable_mosaic.version = 11 : i64} {
  func.func @_mlp_kernel(%arg0: memref<16x128xf32, #tpu.memory_space<vmem>>, %arg1: memref<100x128x128xbf16, #tpu.memory_space<any>>, %arg2: memref<100x1x128xf32, #tpu.memory_space<vmem>>, %arg3: memref<100x1x128xf32, #tpu.memory_space<vmem>>, %arg4: memref<16x128xf32, #tpu.memory_space<vmem>>, %arg5: memref<2x128x128xbf16, #tpu.memory_space<vmem>>, %arg6: memref<2x!tpu.dma_semaphore, #tpu.memory_space<semaphore_mem>>) attributes {dimension_semantics = [], scalar_prefetch = 0 : i64, scratch_operands = 2 : i64, tpu.core_type = #tpu.core_type<tc>} {
    %c0_i32 = arith.constant 0 : i32
    %c0_i32_0 = arith.constant 0 : i32
    %c0_i32_1 = arith.constant 0 : i32
    %c0_i32_2 = arith.constant 0 : i32
    %c0_i32_3 = arith.constant 0 : i32
    %0 = tpu.memref_slice %arg1[%c0_i32, %c0_i32_2, %c0_i32_3] : memref<100x128x128xbf16, #tpu.memory_space<any>> -> memref<1x128x128xbf16, #tpu.memory_space<any>>
    %1 = tpu.memref_squeeze %0 : memref<1x128x128xbf16, #tpu.memory_space<any>> -> memref<128x128xbf16, #tpu.memory_space<any>>
    %c0_i32_4 = arith.constant 0 : i32
    %c0_i32_5 = arith.constant 0 : i32
    %2 = tpu.memref_slice %arg5[%c0_i32_0, %c0_i32_4, %c0_i32_5] : memref<2x128x128xbf16, #tpu.memory_space<vmem>> -> memref<1x128x128xbf16, #tpu.memory_space<vmem>>
    %3 = tpu.memref_squeeze %2 : memref<1x128x128xbf16, #tpu.memory_space<vmem>> -> memref<128x128xbf16, #tpu.memory_space<vmem>>
    %4 = tpu.memref_slice %arg6[%c0_i32_1] : memref<2x!tpu.dma_semaphore, #tpu.memory_space<semaphore_mem>> -> memref<1x!tpu.dma_semaphore, #tpu.memory_space<semaphore_mem>>
    %5 = tpu.memref_squeeze %4 : memref<1x!tpu.dma_semaphore, #tpu.memory_space<semaphore_mem>> -> memref<!tpu.dma_semaphore, #tpu.memory_space<semaphore_mem>>
    tpu.enqueue_dma source(%1 : memref<128x128xbf16, #tpu.memory_space<any>>) target(%3 : memref<128x128xbf16, #tpu.memory_space<vmem>>) target_semaphore(%5 : memref<!tpu.dma_semaphore, #tpu.memory_space<semaphore_mem>>)
    %c0 = arith.constant 0 : index
    %c0_6 = arith.constant 0 : index
    %6 = vector.load %arg0[%c0, %c0_6] : memref<16x128xf32, #tpu.memory_space<vmem>>, vector<16x128xf32>
    %cst = arith.constant 6.250000e-02 : f32
    %cst_7 = arith.constant 9.99999974E-6 : f32
    %c0_i32_8 = arith.constant 0 : i32
    %c50_i32 = arith.constant 50 : i32
    %7 = arith.addi %c0_i32_8, %c50_i32 : i32
    %c1_i32 = arith.constant 1 : i32
    %8 = scf.for %arg7 = %c0_i32_8 to %7 step %c1_i32 iter_args(%arg8 = %6) -> (vector<16x128xf32>)  : i32 {
      %c2_i32 = arith.constant 2 : i32
      %10 = arith.muli %c2_i32, %arg7 : i32
      %c2_i32_12 = arith.constant 2 : i32
      %c0_i32_13 = arith.constant 0 : i32
      %11 = arith.cmpi eq, %c2_i32_12, %c0_i32_13 : i32
      %c1_i32_14 = arith.constant 1 : i32
      %12 = arith.select %11, %c1_i32_14, %c2_i32_12 : i32
      %13 = arith.remsi %10, %12 : i32
      %c0_i32_15 = arith.constant 0 : i32
      %14 = arith.cmpi ne, %13, %c0_i32_15 : i32
      %c0_i32_16 = arith.constant 0 : i32
      %15 = arith.cmpi slt, %13, %c0_i32_16 : i32
      %c0_i32_17 = arith.constant 0 : i32
      %16 = arith.cmpi slt, %12, %c0_i32_17 : i32
      %17 = arith.xori %15, %16 : i1
      %18 = arith.andi %17, %14 : i1
      %19 = arith.addi %13, %12 : i32
      %20 = arith.select %18, %19, %13 : i32
      %c0_i32_18 = arith.constant 0 : i32
      %c0_i32_19 = arith.constant 0 : i32
      %21 = tpu.memref_slice %arg1[%10, %c0_i32_18, %c0_i32_19] : memref<100x128x128xbf16, #tpu.memory_space<any>> -> memref<1x128x128xbf16, #tpu.memory_space<any>>
      %22 = tpu.memref_squeeze %21 : memref<1x128x128xbf16, #tpu.memory_space<any>> -> memref<128x128xbf16, #tpu.memory_space<any>>
      %c0_i32_20 = arith.constant 0 : i32
      %c0_i32_21 = arith.constant 0 : i32
      %23 = tpu.memref_slice %arg5[%20, %c0_i32_20, %c0_i32_21] : memref<2x128x128xbf16, #tpu.memory_space<vmem>> -> memref<1x128x128xbf16, #tpu.memory_space<vmem>>
      %24 = tpu.memref_squeeze %23 : memref<1x128x128xbf16, #tpu.memory_space<vmem>> -> memref<128x128xbf16, #tpu.memory_space<vmem>>
      %25 = tpu.memref_slice %arg6[%20] : memref<2x!tpu.dma_semaphore, #tpu.memory_space<semaphore_mem>> -> memref<1x!tpu.dma_semaphore, #tpu.memory_space<semaphore_mem>>
      %26 = tpu.memref_squeeze %25 : memref<1x!tpu.dma_semaphore, #tpu.memory_space<semaphore_mem>> -> memref<!tpu.dma_semaphore, #tpu.memory_space<semaphore_mem>>
      tpu.wait_dma2 semaphore(%26 : memref<!tpu.dma_semaphore, #tpu.memory_space<semaphore_mem>>) src(%22 : memref<128x128xbf16, #tpu.memory_space<any>>) dst(%24 : memref<128x128xbf16, #tpu.memory_space<vmem>>)
      %c1_i32_22 = arith.constant 1 : i32
      %27 = arith.addi %10, %c1_i32_22 : i32
      %c100_i32 = arith.constant 100 : i32
      %28 = arith.cmpi slt, %27, %c100_i32 : i32
      %29 = arith.extui %28 : i1 to i32
      %c0_i32_23 = arith.constant 0 : i32
      %30 = arith.cmpi ne, %29, %c0_i32_23 : i32
      scf.if %30 {
        %c1_i32_61 = arith.constant 1 : i32
        %125 = arith.addi %10, %c1_i32_61 : i32
        %c1_i32_62 = arith.constant 1 : i32
        %126 = arith.subi %c1_i32_62, %20 : i32
        %c1_i32_63 = arith.constant 1 : i32
        %127 = arith.subi %c1_i32_63, %20 : i32
        %c0_i32_64 = arith.constant 0 : i32
        %c0_i32_65 = arith.constant 0 : i32
        %128 = tpu.memref_slice %arg1[%125, %c0_i32_64, %c0_i32_65] : memref<100x128x128xbf16, #tpu.memory_space<any>> -> memref<1x128x128xbf16, #tpu.memory_space<any>>
        %129 = tpu.memref_squeeze %128 : memref<1x128x128xbf16, #tpu.memory_space<any>> -> memref<128x128xbf16, #tpu.memory_space<any>>
        %c0_i32_66 = arith.constant 0 : i32
        %c0_i32_67 = arith.constant 0 : i32
        %130 = tpu.memref_slice %arg5[%126, %c0_i32_66, %c0_i32_67] : memref<2x128x128xbf16, #tpu.memory_space<vmem>> -> memref<1x128x128xbf16, #tpu.memory_space<vmem>>
        %131 = tpu.memref_squeeze %130 : memref<1x128x128xbf16, #tpu.memory_space<vmem>> -> memref<128x128xbf16, #tpu.memory_space<vmem>>
        %132 = tpu.memref_slice %arg6[%127] : memref<2x!tpu.dma_semaphore, #tpu.memory_space<semaphore_mem>> -> memref<1x!tpu.dma_semaphore, #tpu.memory_space<semaphore_mem>>
        %133 = tpu.memref_squeeze %132 : memref<1x!tpu.dma_semaphore, #tpu.memory_space<semaphore_mem>> -> memref<!tpu.dma_semaphore, #tpu.memory_space<semaphore_mem>>
        tpu.enqueue_dma source(%129 : memref<128x128xbf16, #tpu.memory_space<any>>) target(%131 : memref<128x128xbf16, #tpu.memory_space<vmem>>) target_semaphore(%133 : memref<!tpu.dma_semaphore, #tpu.memory_space<semaphore_mem>>)
      } else {
      }
      %31 = arith.index_cast %20 : i32 to index
      %c0_24 = arith.constant 0 : index
      %c0_25 = arith.constant 0 : index
      %32 = vector.load %arg5[%31, %c0_24, %c0_25] : memref<2x128x128xbf16, #tpu.memory_space<vmem>>, vector<1x128x128xbf16>
      %33 = vector.shape_cast %32 : vector<1x128x128xbf16> to vector<128x128xbf16>
      %34 = arith.truncf %arg8 : vector<16x128xf32> to vector<16x128xbf16>
      %cst_26 = arith.constant dense<0.000000e+00> : vector<16x128xf32>
      %35 = tpu.matmul %34, %33, %cst_26 {dimension_numbers = #tpu.dot_dimension_numbers<[1], [0], [0], [1], [0, 0, 1, 1], [], []>} : vector<16x128xbf16>, vector<128x128xbf16>, vector<16x128xf32> -> vector<16x128xf32>
      %cst_27 = arith.constant dense<0.000000e+00> : vector<128xf32>
      %36 = vector.multi_reduction <add>, %35, %cst_27 [0] : vector<16x128xf32> to vector<128xf32>
      %37 = vector.shape_cast %36 : vector<128xf32> to vector<1x128xf32>
      %38 = vector.broadcast %cst : f32 to vector<1x128xf32>
      %39 = arith.mulf %37, %38 : vector<1x128xf32>
      %40 = arith.mulf %35, %35 : vector<16x128xf32>
      %cst_28 = arith.constant dense<0.000000e+00> : vector<128xf32>
      %41 = vector.multi_reduction <add>, %40, %cst_28 [0] : vector<16x128xf32> to vector<128xf32>
      %42 = vector.shape_cast %41 : vector<128xf32> to vector<1x128xf32>
      %43 = vector.broadcast %cst : f32 to vector<1x128xf32>
      %44 = arith.mulf %42, %43 : vector<1x128xf32>
      %45 = arith.mulf %39, %39 : vector<1x128xf32>
      %46 = arith.subf %44, %45 : vector<1x128xf32>
      %cst_29 = arith.constant 0.000000e+00 : f32
      %47 = vector.broadcast %cst_29 : f32 to vector<1x128xf32>
      %48 = arith.maximumf %46, %47 : vector<1x128xf32>
      %49 = arith.index_cast %10 : i32 to index
      %c0_30 = arith.constant 0 : index
      %c0_31 = arith.constant 0 : index
      %50 = vector.load %arg2[%49, %c0_30, %c0_31] : memref<100x1x128xf32, #tpu.memory_space<vmem>>, vector<1x1x128xf32>
      %51 = vector.shape_cast %50 : vector<1x1x128xf32> to vector<1x128xf32>
      %52 = vector.broadcast %cst_7 : f32 to vector<1x128xf32>
      %53 = arith.addf %48, %52 : vector<1x128xf32>
      %54 = math.rsqrt %53 : vector<1x128xf32>
      %55 = arith.mulf %51, %54 : vector<1x128xf32>
      %56 = arith.index_cast %10 : i32 to index
      %c0_32 = arith.constant 0 : index
      %c0_33 = arith.constant 0 : index
      %57 = vector.load %arg3[%56, %c0_32, %c0_33] : memref<100x1x128xf32, #tpu.memory_space<vmem>>, vector<1x1x128xf32>
      %58 = vector.shape_cast %57 : vector<1x1x128xf32> to vector<1x128xf32>
      %59 = arith.mulf %39, %55 : vector<1x128xf32>
      %60 = arith.subf %58, %59 : vector<1x128xf32>
      %61 = vector.broadcast %55 : vector<1x128xf32> to vector<16x128xf32>
      %62 = arith.mulf %35, %61 : vector<16x128xf32>
      %63 = vector.broadcast %60 : vector<1x128xf32> to vector<16x128xf32>
      %64 = arith.addf %62, %63 : vector<16x128xf32>
      %cst_34 = arith.constant 0.000000e+00 : f32
      %65 = vector.broadcast %cst_34 : f32 to vector<16x128xf32>
      %66 = arith.maximumf %64, %65 : vector<16x128xf32>
      %c2_i32_35 = arith.constant 2 : i32
      %67 = arith.muli %c2_i32_35, %arg7 : i32
      %c1_i32_36 = arith.constant 1 : i32
      %68 = arith.addi %67, %c1_i32_36 : i32
      %c2_i32_37 = arith.constant 2 : i32
      %c0_i32_38 = arith.constant 0 : i32
      %69 = arith.cmpi eq, %c2_i32_37, %c0_i32_38 : i32
      %c1_i32_39 = arith.constant 1 : i32
      %70 = arith.select %69, %c1_i32_39, %c2_i32_37 : i32
      %71 = arith.remsi %68, %70 : i32
      %c0_i32_40 = arith.constant 0 : i32
      %72 = arith.cmpi ne, %71, %c0_i32_40 : i32
      %c0_i32_41 = arith.constant 0 : i32
      %73 = arith.cmpi slt, %71, %c0_i32_41 : i32
      %c0_i32_42 = arith.constant 0 : i32
      %74 = arith.cmpi slt, %70, %c0_i32_42 : i32
      %75 = arith.xori %73, %74 : i1
      %76 = arith.andi %75, %72 : i1
      %77 = arith.addi %71, %70 : i32
      %78 = arith.select %76, %77, %71 : i32
      %c0_i32_43 = arith.constant 0 : i32
      %c0_i32_44 = arith.constant 0 : i32
      %79 = tpu.memref_slice %arg1[%68, %c0_i32_43, %c0_i32_44] : memref<100x128x128xbf16, #tpu.memory_space<any>> -> memref<1x128x128xbf16, #tpu.memory_space<any>>
      %80 = tpu.memref_squeeze %79 : memref<1x128x128xbf16, #tpu.memory_space<any>> -> memref<128x128xbf16, #tpu.memory_space<any>>
      %c0_i32_45 = arith.constant 0 : i32
      %c0_i32_46 = arith.constant 0 : i32
      %81 = tpu.memref_slice %arg5[%78, %c0_i32_45, %c0_i32_46] : memref<2x128x128xbf16, #tpu.memory_space<vmem>> -> memref<1x128x128xbf16, #tpu.memory_space<vmem>>
      %82 = tpu.memref_squeeze %81 : memref<1x128x128xbf16, #tpu.memory_space<vmem>> -> memref<128x128xbf16, #tpu.memory_space<vmem>>
      %83 = tpu.memref_slice %arg6[%78] : memref<2x!tpu.dma_semaphore, #tpu.memory_space<semaphore_mem>> -> memref<1x!tpu.dma_semaphore, #tpu.memory_space<semaphore_mem>>
      %84 = tpu.memref_squeeze %83 : memref<1x!tpu.dma_semaphore, #tpu.memory_space<semaphore_mem>> -> memref<!tpu.dma_semaphore, #tpu.memory_space<semaphore_mem>>
      tpu.wait_dma2 semaphore(%84 : memref<!tpu.dma_semaphore, #tpu.memory_space<semaphore_mem>>) src(%80 : memref<128x128xbf16, #tpu.memory_space<any>>) dst(%82 : memref<128x128xbf16, #tpu.memory_space<vmem>>)
      %c1_i32_47 = arith.constant 1 : i32
      %85 = arith.addi %68, %c1_i32_47 : i32
      %c100_i32_48 = arith.constant 100 : i32
      %86 = arith.cmpi slt, %85, %c100_i32_48 : i32
      %87 = arith.extui %86 : i1 to i32
      %c0_i32_49 = arith.constant 0 : i32
      %88 = arith.cmpi ne, %87, %c0_i32_49 : i32
      scf.if %88 {
        %c1_i32_61 = arith.constant 1 : i32
        %125 = arith.addi %68, %c1_i32_61 : i32
        %c1_i32_62 = arith.constant 1 : i32
        %126 = arith.subi %c1_i32_62, %78 : i32
        %c1_i32_63 = arith.constant 1 : i32
        %127 = arith.subi %c1_i32_63, %78 : i32
        %c0_i32_64 = arith.constant 0 : i32
        %c0_i32_65 = arith.constant 0 : i32
        %128 = tpu.memref_slice %arg1[%125, %c0_i32_64, %c0_i32_65] : memref<100x128x128xbf16, #tpu.memory_space<any>> -> memref<1x128x128xbf16, #tpu.memory_space<any>>
        %129 = tpu.memref_squeeze %128 : memref<1x128x128xbf16, #tpu.memory_space<any>> -> memref<128x128xbf16, #tpu.memory_space<any>>
        %c0_i32_66 = arith.constant 0 : i32
        %c0_i32_67 = arith.constant 0 : i32
        %130 = tpu.memref_slice %arg5[%126, %c0_i32_66, %c0_i32_67] : memref<2x128x128xbf16, #tpu.memory_space<vmem>> -> memref<1x128x128xbf16, #tpu.memory_space<vmem>>
        %131 = tpu.memref_squeeze %130 : memref<1x128x128xbf16, #tpu.memory_space<vmem>> -> memref<128x128xbf16, #tpu.memory_space<vmem>>
        %132 = tpu.memref_slice %arg6[%127] : memref<2x!tpu.dma_semaphore, #tpu.memory_space<semaphore_mem>> -> memref<1x!tpu.dma_semaphore, #tpu.memory_space<semaphore_mem>>
        %133 = tpu.memref_squeeze %132 : memref<1x!tpu.dma_semaphore, #tpu.memory_space<semaphore_mem>> -> memref<!tpu.dma_semaphore, #tpu.memory_space<semaphore_mem>>
        tpu.enqueue_dma source(%129 : memref<128x128xbf16, #tpu.memory_space<any>>) target(%131 : memref<128x128xbf16, #tpu.memory_space<vmem>>) target_semaphore(%133 : memref<!tpu.dma_semaphore, #tpu.memory_space<semaphore_mem>>)
      } else {
      }
      %89 = arith.index_cast %78 : i32 to index
      %c0_50 = arith.constant 0 : index
      %c0_51 = arith.constant 0 : index
      %90 = vector.load %arg5[%89, %c0_50, %c0_51] : memref<2x128x128xbf16, #tpu.memory_space<vmem>>, vector<1x128x128xbf16>
      %91 = vector.shape_cast %90 : vector<1x128x128xbf16> to vector<128x128xbf16>
      %92 = arith.truncf %66 : vector<16x128xf32> to vector<16x128xbf16>
      %cst_52 = arith.constant dense<0.000000e+00> : vector<16x128xf32>
      %93 = tpu.matmul %92, %91, %cst_52 {dimension_numbers = #tpu.dot_dimension_numbers<[1], [0], [0], [1], [0, 0, 1, 1], [], []>} : vector<16x128xbf16>, vector<128x128xbf16>, vector<16x128xf32> -> vector<16x128xf32>
      %cst_53 = arith.constant dense<0.000000e+00> : vector<128xf32>
      %94 = vector.multi_reduction <add>, %93, %cst_53 [0] : vector<16x128xf32> to vector<128xf32>
      %95 = vector.shape_cast %94 : vector<128xf32> to vector<1x128xf32>
      %96 = vector.broadcast %cst : f32 to vector<1x128xf32>
      %97 = arith.mulf %95, %96 : vector<1x128xf32>
      %98 = arith.mulf %93, %93 : vector<16x128xf32>
      %cst_54 = arith.constant dense<0.000000e+00> : vector<128xf32>
      %99 = vector.multi_reduction <add>, %98, %cst_54 [0] : vector<16x128xf32> to vector<128xf32>
      %100 = vector.shape_cast %99 : vector<128xf32> to vector<1x128xf32>
      %101 = vector.broadcast %cst : f32 to vector<1x128xf32>
      %102 = arith.mulf %100, %101 : vector<1x128xf32>
      %103 = arith.mulf %97, %97 : vector<1x128xf32>
      %104 = arith.subf %102, %103 : vector<1x128xf32>
      %cst_55 = arith.constant 0.000000e+00 : f32
      %105 = vector.broadcast %cst_55 : f32 to vector<1x128xf32>
      %106 = arith.maximumf %104, %105 : vector<1x128xf32>
      %107 = arith.index_cast %68 : i32 to index
      %c0_56 = arith.constant 0 : index
      %c0_57 = arith.constant 0 : index
      %108 = vector.load %arg2[%107, %c0_56, %c0_57] : memref<100x1x128xf32, #tpu.memory_space<vmem>>, vector<1x1x128xf32>
      %109 = vector.shape_cast %108 : vector<1x1x128xf32> to vector<1x128xf32>
      %110 = vector.broadcast %cst_7 : f32 to vector<1x128xf32>
      %111 = arith.addf %106, %110 : vector<1x128xf32>
      %112 = math.rsqrt %111 : vector<1x128xf32>
      %113 = arith.mulf %109, %112 : vector<1x128xf32>
      %114 = arith.index_cast %68 : i32 to index
      %c0_58 = arith.constant 0 : index
      %c0_59 = arith.constant 0 : index
      %115 = vector.load %arg3[%114, %c0_58, %c0_59] : memref<100x1x128xf32, #tpu.memory_space<vmem>>, vector<1x1x128xf32>
      %116 = vector.shape_cast %115 : vector<1x1x128xf32> to vector<1x128xf32>
      %117 = arith.mulf %97, %113 : vector<1x128xf32>
      %118 = arith.subf %116, %117 : vector<1x128xf32>
      %119 = vector.broadcast %113 : vector<1x128xf32> to vector<16x128xf32>
      %120 = arith.mulf %93, %119 : vector<16x128xf32>
      %121 = vector.broadcast %118 : vector<1x128xf32> to vector<16x128xf32>
      %122 = arith.addf %120, %121 : vector<16x128xf32>
      %cst_60 = arith.constant 0.000000e+00 : f32
      %123 = vector.broadcast %cst_60 : f32 to vector<16x128xf32>
      %124 = arith.maximumf %122, %123 : vector<16x128xf32>
      scf.yield %124 : vector<16x128xf32>
    }
    %c50_i32_9 = arith.constant 50 : i32
    %c0_10 = arith.constant 0 : index
    %c0_11 = arith.constant 0 : index
    %9 = vector.load %arg4[%c0_10, %c0_11] : memref<16x128xf32, #tpu.memory_space<vmem>>, vector<16x128xf32>
    tpu.vector_store %arg4[%c0_10, %c0_11], %8 {strides = array<i32>} : memref<16x128xf32, #tpu.memory_space<vmem>>, vector<16x128xf32>,
    return
  }
}

</mosaic_0001>

<bundles_post_ra>
// kernel: mlp_forward_padded.1
= control target key start
LH: loop header
LB: loop body
LE: loop exit
PB: predicated region body
PF: predicated region fallthrough
CT: control target
= control target key end

     0   :  { %9 = vsyncpa [#allocation5], 0  ;;  %s993_s0 = inlined_call_operand.vmem [shape: f32[16,128], index: 0, kind: input, shape index: {}]   ;;  %s994_s1 = inlined_call_operand.hbm [shape: bf16[100,128,128], index: 1, kind: input, shape index: {}]   ;;  %s995_s2 = inlined_call_operand.hbm [shape: f32[100,1,128], index: 2, kind: input, shape index: {}]   ;;  %s996_s3 = inlined_call_operand.hbm [shape: f32[100,1,128], index: 3, kind: input, shape index: {}]   ;;  %s997_s4 = inlined_call_operand.hbm [shape: f32[16,128], index: 4, kind: output, shape index: {}]  }
   0x1   :  { %10 = vsyncpa [#allocation8], 0 }
   0x2   :  { %11 = vsyncpa [#allocation6], 0  ;;  %s738_s15 = smov [#allocation4]   ;;  %s558_s19 = scalar_lea.hbm %s995_s2, 1600 }
   0x3   :  { %s19_s16 = sshll.u32 %s738_s15, 4  ;;  %p559_p0 = scmp.ne.s32.totalorder %s995_s2, %s558_s19  ;;  %s20_s16 = int_to_ptr.vmem [resolvable:$true] %s19_s16 }
   0x4   :  { %p562_p1 = scmp.lt.u32.totalorder %s558_s19, %s995_s2 }
   0x6   :  { %p564_p2 = pnand %p562_p1, %p559_p0 }
   0x8   :  { %567 = shalt.err (!%p564_p2)
}
   0x9   :  { %s568_s24 = scalar_lea.vmem %s20_s16, 1600  ;;  %p573_p4 = scmp.lt.s32.totalorder %s20_s16, %s20_s16 }
   0xa   :  { %p569_p3 = scmp.ne.s32.totalorder %s20_s16, %s568_s24  ;;  %p574_p5 = scmp.lt.s32.totalorder %s568_s24, %s568_s24 }
   0xc   :  { %p575_p6 = por %p574_p5, %p573_p4 }
   0xe   :  { %p576_p7 = pnand %p575_p6, %p569_p3 }
  0x10   :  { %579 = shalt.err (!%p576_p7)
}
  0x11   :  { %s739_s25 = smov 16   ;;  %s740_s26 = smov 1  }
  0x12   :  { %25 = dma.hbm_to_vmem [thread:$0]  %s995_s2, 1600, %s20_s16, [#allocation5], %s739_s25, %s739_s25, %s740_s26  }
  0x13   :  { %s741_s29 = smov [#allocation7]   ;;  %s580_s7 = scalar_lea.hbm %s996_s3, 1600 }
  0x14   :  { %s31_s30 = sshll.u32 %s741_s29, 4  ;;  %p581_p8 = scmp.ne.s32.totalorder %s996_s3, %s580_s7  ;;  %s32_s30 = int_to_ptr.vmem [resolvable:$true] %s31_s30 }
  0x15   :  { %p584_p9 = scmp.lt.u32.totalorder %s580_s7, %s996_s3 }
  0x17   :  { %p586_p10 = pnand %p584_p9, %p581_p8 }
  0x19   :  { %589 = shalt.err (!%p586_p10)
}
  0x1a   :  { %s590_s12 = scalar_lea.vmem %s32_s30, 1600  ;;  %p595_p12 = scmp.lt.s32.totalorder %s32_s30, %s32_s30 }
  0x1b   :  { %p591_p11 = scmp.ne.s32.totalorder %s32_s30, %s590_s12  ;;  %p596_p13 = scmp.lt.s32.totalorder %s590_s12, %s590_s12 }
  0x1d   :  { %p597_p0 = por %p596_p13, %p595_p12 }
  0x1f   :  { %p598_p1 = pnand %p597_p0, %p591_p11 }
  0x21   :  { %601 = shalt.err (!%p598_p1)
}
  0x22   :  { %37 = dma.hbm_to_vmem [thread:$0]  %s996_s3, 1600, %s32_s30, [#allocation8], %s739_s25, %s739_s25, %s740_s26  }
  0x23   :  { %716 = dma.done.wait [#allocation5], 1600  }
  0x24   :  { %717 = vsyncadd [#allocation5], 4294965696 }
  0x25   :  { %718 = dma.done.wait [#allocation8], 1600  }
  0x26   :  { %719 = vsyncadd [#allocation8], 4294965696  ;;  %s742_s14 = smov [#allocation2]   ;;  %s602_s18 = scalar_lea.hbm %s994_s1, 1024 }
  0x27   :  { %s52_s15 = sshll.u32 %s742_s14, 4  ;;  %p603_p2 = scmp.ne.s32.totalorder %s994_s1, %s602_s18  ;;  %s797_s15 = int_to_ptr.vmem [resolvable:$true] %s52_s15 }
  0x28   :  { %s808_s3 = scalar_lea.hbm %s994_s1, 102400  ;;  %p606_p4 = scmp.lt.u32.totalorder %s602_s18, %s994_s1 }
  0x29   :  { %p605_p3 = scmp.lt.u32.totalorder %s808_s3, %s602_s18 }
  0x2b   :  { %p607_p5 = por %p606_p4, %p605_p3 }
  0x2d   :  { %p608_p6 = pnand %p607_p5, %p603_p2 }
  0x2f   :  { %611 = shalt.err (!%p608_p6)  }
  0x30   :  { %s612_s25 = scalar_lea.vmem %s797_s15, 1024  ;;  %s817_s26 = scalar_lea.vmem %s797_s15, 2048 }
  0x31   :  { %p613_p7 = scmp.ne.s32.totalorder %s797_s15, %s612_s25  ;;  %p617_p8 = scmp.lt.s32.totalorder %s797_s15, %s797_s15 }
  0x32   :  { %p618_p9 = scmp.lt.s32.totalorder %s817_s26, %s612_s25 }
  0x34   :  { %p619_p10 = por %p618_p9, %p617_p8 }
  0x36   :  { %p620_p11 = pnand %p619_p10, %p613_p7 }
  0x38   :  { %623 = shalt.err (!%p620_p11)  }
  0x39   :  { %55 = dma.hbm_to_vmem [thread:$0]  %s994_s1, 1024, %s797_s15, [#allocation3]  ;;  %v56_v0 = vld [vmem:[%s993_s0] sm:$0xff]   ;;  %v57_v1 = vld [vmem:[%s993_s0 + $0x8] sm:$0xff]  }
  0x3a   :  { %s836_s7 = smov 0  }
  0x3b LB: > { %s848_s8 = sshll.u32 %s736_s7, 1  ;;  %s736_s7 = sphi %s836_s7, %s63_s7   ;;  %v732_v0 = vphi %v56_v0, %v1001_v0   ;;  %v728_v1 = vphi %v57_v1, %v1000_v1  }
  0x3c   : > { %p67_p12 = scmp.lt.s32.totalorder %s848_s8, 0  ;;  %s68_s0 = ssub.s32 0, %s848_s8 }
  0x3d   : > { %s424_s9 = smin.u32 %s848_s8, %s68_s0 }
  0x3e   : > { %s70_s10 = sand.u32 1, %s424_s9  }
  0x3f   : > { %s71_s11 = ssub.s32 0, %s70_s10 }
  0x40   : > { %s1003_s11 = smov (!%p67_p12, %s71_s11), %s70_s10 }
  0x41   : > { %p426_p13 = scmp.lt.s32.totalorder %s1003_s11, 0  ;;  %s77_s12 = sadd.s32 2, %s1003_s11 }
  0x43   : > { %s1005_s12 = smov (!%p426_p13, %s77_s12), %s1003_s11 }
  0x44   : > { %s450_s2 = sshll.u32 %s1005_s12, 6  ;;  %s82_s14 = scalar_lea.sflag [#allocation3], %s1005_s12 }
  0x45   : > { %s853_s13 = scalar_lea.vmem [#allocation2], %s450_s2 }
  0x46   : > { %720 = dma.done.wait %s82_s14, 1024 }
  0x47   : > { %721 = vsyncadd %s82_s14, 4294966272  ;;  %s856_s16 = sadd.s32 1, %s848_s8  ;;  %s92_s17 = ssub.s32 1, %s1005_s12  ;;  %v743_v2 = vmov 0.0   ;;  %vm744_vm0 = vmmov 0  }
  0x48   : > { %p518_p0 = scmp.lt.s32.totalorder %s856_s16, 100  ;;  %474 = vmatprep.subr.bf16.mxu0 %v743_v2  ;;  %490 = vmatprep.mubr.msk.bf16.mxu0 %vm744_vm0, %v743_v2  ;;  %s451_s18 = sshll.u32 %s736_s7, 11 }
  0x49   : > { %s452_s19 = sshll.u32 %s92_s17, 6  ;;  %s866_s22 = scalar_lea.hbm %s994_s1, %s451_s18 }
  0x4a   : > { %s388_s23 = scalar_lea.hbm %s866_s22, 1024  ;;  %s98_s24 = scalar_lea.vmem [#allocation2], %s452_s19 }
  0x4b   : > { %s107_s25 = sshll.u32 %s98_s24, 4  ;;  %s210_s27 = ssub.s32 0, %s856_s16  ;;  %s108_s25 = int_to_ptr.vmem [resolvable:$true] %s107_s25 }
  0x4c   : > { %s99_s28 = scalar_lea.sflag [#allocation3], %s92_s17  ;;  %s872_s29 = scalar_lea.hbm %s866_s22, 2048 }
  0x4d   : > { %p625_p2 = scmp.ne.s32.totalorder %s388_s23, %s872_s29  ;;  %p629_p5 = scmp.lt.u32.totalorder %s388_s23, %s994_s1 }
  0x4e   : > { %p630_p6 = scmp.lt.u32.totalorder %s808_s3, %s872_s29  ;;  %p632_p8 = scmp.lt.u32.totalorder %s872_s29, %s388_s23 }
  0x4f   : > { %p626_p3 = pnand %p625_p2, %p518_p0 }
  0x50   : > { %p631_p7 = por %p630_p6, %p629_p5 }
  0x51   : > { %p627_p4 = pneg %p626_p3 }
  0x52   : > { %p633_p9 = por %p632_p8, %p631_p7 }
  0x54   : > { %p634_p10 = pnand %p633_p9, %p627_p4 }
  0x56   : > { %637 = shalt.err (!%p634_p10)  }
  0x57   : > { %s638_s6 = scalar_lea.vmem %s108_s25, 1024  ;;  %p645_p2 = scmp.lt.s32.totalorder %s108_s25, %s797_s15 }
  0x58   : > { %p639_p11 = scmp.ne.s32.totalorder %s108_s25, %s638_s6  ;;  %p646_p3 = scmp.lt.s32.totalorder %s817_s26, %s638_s6 }
  0x5a   : > { %p640_p12 = pnand %p639_p11, %p518_p0  ;;  %p647_p1 = por %p646_p3, %p645_p2 }
  0x5c   : > { %p641_p13 = pneg %p640_p12 }
  0x5e   : > { %p648_p5 = pnand %p647_p1, %p641_p13 }
  0x60   : > { %651 = shalt.err (!%p648_p5)  }
  0x61   : > { %515 = dma.hbm_to_vmem [thread:$0]  (%p518_p0), %s388_s23, 1024, %s108_s25, %s99_s28  ;;  %v119_v11 = vpack.c.bf16 %v728_v1, %v732_v0  ;;  %v192_v38 = vlaneseq }
  0x62   : > { %s434_s0 = smin.u32 %s210_s27, %s856_s16  ;;  %p998_p4 = scmp.lt.s32.totalorder %s856_s16, 0  ;;  %v111_v3 = vld [vmem:[%s853_s13] sm:$0xff]  ;;  %v112_v4 = vld [vmem:[%s853_s13 + $0x8] sm:$0xff]  ;;  %v113_v5 = vld [vmem:[%s853_s13 + $0x10] sm:$0xff] }
  0x63   : > { %s212_s9 = sand.u32 1, %s434_s0   ;;  %475 = vmatpush3.bf16.msra.mxu0 %v111_v3  ;;  %v114_v6 = vld [vmem:[%s853_s13 + $0x18] sm:$0xff]  ;;  %v115_v7 = vld [vmem:[%s853_s13 + $0x20] sm:$0xff]  ;;  %v116_v8 = vld [vmem:[%s853_s13 + $0x28] sm:$0xff]  ;;  %v193_v39 = vshrl.u32 %v192_v38, 7  ;;  %s182_s2 = scalar_lea.vmem [#allocation4], %s848_s8 }
  0x64   : > { %s213_s10 = ssub.s32 0, %s212_s9  ;;  %476 = vmatprep.subr.bf16.mxu0 %v743_v2  ;;  %v117_v9 = vld [vmem:[%s853_s13 + $0x30] sm:$0xff]  ;;  %v118_v10 = vld [vmem:[%s853_s13 + $0x38] sm:$0xff]  ;;  %v183_v40 = vld [vmem:[%s182_s2] sm:$0x1]  ;;  %s187_s13 = scalar_lea.vmem [#allocation7], %s848_s8 }
  0x65   : > { %s1007_s10 = smov (!%p998_p4, %s213_s10), %s212_s9  ;;  %v915_v41 = vsub.s32 0, %v193_v39  ;;  %v188_v44 = vld [vmem:[%s187_s13] sm:$0x1] }
  0x66   : > { %p436_p6 = scmp.lt.s32.totalorder %s1007_s10, 0  ;;  %s219_s11 = sadd.s32 2, %s1007_s10 }
  0x67   : > { %477 = vmatpush3.bf16.msra.mxu0 %v112_v4 }
  0x68   : > { %s1009_s11 = smov (!%p436_p6, %s219_s11), %s1007_s10  ;;  %478 = vmatprep.subr.bf16.mxu0 %v743_v2 }
  0x69   : > { %s453_s12 = sshll.u32 %s1009_s11, 6  ;;  %s224_s16 = scalar_lea.sflag [#allocation3], %s1009_s11 }
  0x6a   : > { %s924_s14 = scalar_lea.vmem [#allocation2], %s453_s12 }
  0x6b   : > { %479 = vmatpush3.bf16.msra.mxu0 %v113_v5 }
  0x6c   : > { %480 = vmatprep.subr.bf16.mxu0 %v743_v2 }
  0x6f   : > { %481 = vmatpush3.bf16.msra.mxu0 %v114_v6 }
  0x70   : > { %482 = vmatprep.subr.bf16.mxu0 %v743_v2 }
  0x73   : > { %483 = vmatpush3.bf16.msra.mxu0 %v115_v7 }
  0x74   : > { %484 = vmatprep.subr.bf16.mxu0 %v743_v2 }
  0x77   : > { %485 = vmatpush3.bf16.msra.mxu0 %v116_v8 }
  0x78   : > { %486 = vmatprep.subr.bf16.mxu0 %v743_v2 }
  0x7b   : > { %487 = vmatpush3.bf16.msra.mxu0 %v117_v9 }
  0x7c   : > { %488 = vmatprep.subr.bf16.mxu0 %v743_v2 }
  0x7f   : > { %489 = vmatpush3.bf16.msra.mxu0 %v118_v10 }
  0x82   : > { %491 = vmatmul.mubr.bf16.vlgmr.msra.gmra.mrb[0].mxu0 %v119_v11 }
 0x155   : > { %v154_v12 = vpop.f32.mrb[0].mxu0 }
 0x156   : > { %v492_v13 = vpop.f32.mrb[1].mxu0  ;;  %v169_v15 = vmul.f32 %v154_v12, %v154_v12 }
 0x157   : > { %v157_v14 = vpop.f32.mrb[2].mxu0 }
 0x158   : > { %v161_v16 = vadd.f32 %v157_v14, %v154_v12  ;;  %v170_v17 = vmul.f32 %v157_v14, %v157_v14  ;;  %v493_v18 = vpop.f32.mrb[3].mxu0 }
 0x15a   : > { %v162_v19 = vrot.slane %v161_v16, 4  ;;  %v171_v20 = vadd.f32 %v170_v17, %v169_v15 }
 0x15c   : > { %v163_v21 = vadd.f32 %v162_v19, %v161_v16  ;;  %v172_v22 = vrot.slane %v171_v20, 4 }
 0x15e   : > { %v164_v23 = vrot.slane %v163_v21, 2  ;;  %v173_v24 = vadd.f32 %v172_v22, %v171_v20 }
 0x160   : > { %v165_v25 = vadd.f32 %v164_v23, %v163_v21  ;;  %v174_v26 = vrot.slane %v173_v24, 2 }
 0x162   : > { %v166_v27 = vrot.slane %v165_v25, 1  ;;  %v175_v28 = vadd.f32 %v174_v26, %v173_v24 }
 0x164   : > { %v167_v29 = vadd.f32 %v166_v27, %v165_v25  ;;  %v176_v30 = vrot.slane %v175_v28, 1 }
 0x166   : > { %v168_v31 = vmul.f32 0.0625, %v167_v29  ;;  %v177_v32 = vadd.f32 %v176_v30, %v175_v28 }
 0x168   : > { %v178_v33 = vmul.f32 0.0625, %v177_v32  ;;  %v179_v34 = vmul.f32 %v168_v31, %v168_v31 }
 0x16a   : > { %v180_v35 = vsub.f32 %v178_v33, %v179_v34 }
 0x16c   : > { %v181_v36 = vmax.f32 %v180_v35, 0.0 }
 0x16e   : > { %v184_v37 = vadd.f32 1e-05, %v181_v36 }
 0x170   : > { %554 = vrsqrt.f32 %v184_v37 }
 0x17a   : > { %v555_v42 = vpop.eup %554 }
 0x17b   : > { %v186_v43 = vmul.f32 %v555_v42, %v183_v40 }
 0x17d   : > { %v189_v45 = vmul.f32 %v186_v43, %v168_v31  ;;  %v195_v46 = vrot.slane %v186_v43, %v915_v41 }
 0x17f   : > { %v190_v47 = vsub.f32 %v188_v44, %v189_v45  ;;  %v197_v48 = vmul.f32 %v195_v46, %v154_v12  ;;  %v198_v49 = vmul.f32 %v195_v46, %v157_v14 }
 0x181   : > { %v203_v50 = vrot.slane %v190_v47, %v915_v41 }
 0x183   : > { %v205_v51 = vadd.f32 %v203_v50, %v197_v48  ;;  %v206_v52 = vadd.f32 %v203_v50, %v198_v49 }
 0x185   : > { %v207_v53 = vmax.f32 %v205_v51, 0.0  ;;  %v208_v54 = vmax.f32 %v206_v52, 0.0 }
 0x186   : > { %722 = dma.done.wait %s224_s16, 1024 }
 0x187   : > { %723 = vsyncadd %s224_s16, 4294966272  ;;  %s227_s17 = sadd.s32 2, %s848_s8  ;;  %s232_s18 = ssub.s32 1, %s1009_s11  ;;  %494 = vmatprep.subr.bf16.mxu1 %v743_v2  ;;  %510 = vmatprep.mubr.msk.bf16.mxu1 %vm744_vm0, %v743_v2 }
 0x188   : > { %p932_p0 = scmp.lt.s32.totalorder %s227_s17, 100  ;;  %s455_s20 = sshll.u32 %s232_s18, 6 }
 0x189   : > { %s238_s21 = scalar_lea.vmem [#allocation2], %s455_s20  ;;  %s239_s24 = scalar_lea.sflag [#allocation3], %s232_s18 }
 0x18a   : > { %s247_s23 = sshll.u32 %s238_s21, 4  ;;  %s681_s25 = scalar_lea.hbm %s866_s22, 3072  ;;  %s248_s23 = int_to_ptr.vmem [resolvable:$true] %s247_s23 }
 0x18b   : > { %p654_p1 = scmp.ne.s32.totalorder %s872_s29, %s681_s25  ;;  %p658_p9 = scmp.lt.u32.totalorder %s872_s29, %s994_s1 }
 0x18c   : > { %p659_p10 = scmp.lt.u32.totalorder %s808_s3, %s681_s25  ;;  %p661_p12 = scmp.lt.u32.totalorder %s681_s25, %s872_s29 }
 0x18d   : > { %p655_p7 = pnand %p654_p1, %p932_p0 }
 0x18e   : > { %p660_p11 = por %p659_p10, %p658_p9 }
 0x18f   : > { %p656_p8 = pneg %p655_p7 }
 0x190   : > { %p662_p13 = por %p661_p12, %p660_p11 }
 0x192   : > { %p663_p2 = pnand %p662_p13, %p656_p8 }
 0x194   : > { %666 = shalt.err (!%p663_p2)  }
 0x195   : > { %s667_s30 = scalar_lea.vmem %s248_s23, 1024  ;;  %p674_p6 = scmp.lt.s32.totalorder %s248_s23, %s797_s15 }
 0x196   : > { %p668_p3 = scmp.ne.s32.totalorder %s248_s23, %s667_s30  ;;  %p675_p1 = scmp.lt.s32.totalorder %s817_s26, %s667_s30 }
 0x198   : > { %p669_p5 = pnand %p668_p3, %p932_p0  ;;  %p676_p7 = por %p675_p1, %p674_p6 }
 0x19a   : > { %p670_p4 = pneg %p669_p5 }
 0x19c   : > { %p677_p9 = pnand %p676_p7, %p670_p4 }
 0x19e   : > { %680 = shalt.err (!%p677_p9)  }
 0x19f   : > { %517 = dma.hbm_to_vmem [thread:$0]  (%p932_p0), %s872_s29, 1024, %s248_s23, %s239_s24  ;;  %v259_v63 = vpack.c.bf16 %v208_v54, %v207_v53  ;;  %v445_v26 = vld [vmem:[%s182_s2 + $0x1] sm:$0x1] }
 0x1a0   : > { %v251_v55 = vld [vmem:[%s924_s14] sm:$0xff]  ;;  %v252_v56 = vld [vmem:[%s924_s14 + $0x8] sm:$0xff]  ;;  %v253_v57 = vld [vmem:[%s924_s14 + $0x10] sm:$0xff]  ;;  %s63_s7 = sadd.s32 1, %s736_s7  }
 0x1a1   : > { %495 = vmatpush3.bf16.msra.mxu1 %v251_v55  ;;  %v254_v58 = vld [vmem:[%s924_s14 + $0x18] sm:$0xff]  ;;  %v255_v59 = vld [vmem:[%s924_s14 + $0x20] sm:$0xff]  ;;  %v256_v60 = vld [vmem:[%s924_s14 + $0x28] sm:$0xff]  ;;  %p60_p0 = scmp.ge.s32.totalorder %s63_s7, 50  }
 0x1a2   : > { %496 = vmatprep.subr.bf16.mxu1 %v743_v2  ;;  %v257_v61 = vld [vmem:[%s924_s14 + $0x30] sm:$0xff]  ;;  %v258_v62 = vld [vmem:[%s924_s14 + $0x38] sm:$0xff]  ;;  %v447_v29 = vld [vmem:[%s187_s13 + $0x1] sm:$0x1]  ;;  %s745_s8 = smov (%p60_p0), [#allocation9]  }
 0x1a3   :  { %s356_s22 = sshll.u32 (%p60_p0), %s745_s8, 4  ;;  %s357_s22 = int_to_ptr.vmem [resolvable:$true] %s356_s22 }
 0x1a4   :  { %s682_s29 = scalar_lea.vmem (%p60_p0), %s357_s22, 256  ;;  %p687_p10 = scmp.lt.s32.totalorder (%p60_p0), %s357_s22, %s357_s22 }
 0x1a5   : > { %497 = vmatpush3.bf16.msra.mxu1 %v252_v56  ;;  %p683_p8 = scmp.ne.s32.totalorder (%p60_p0), %s357_s22, %s682_s29  ;;  %p688_p11 = scmp.lt.s32.totalorder (%p60_p0), %s682_s29, %s682_s29 }
 0x1a6   : > { %498 = vmatprep.subr.bf16.mxu1 %v743_v2 }
 0x1a7   :  { %p689_p12 = por (%p60_p0), %p688_p11, %p687_p10 }
 0x1a9   : > { %499 = vmatpush3.bf16.msra.mxu1 %v253_v57  ;;  %p690_p13 = pnand (%p60_p0), %p689_p12, %p683_p8 }
 0x1aa   : > { %500 = vmatprep.subr.bf16.mxu1 %v743_v2 }
 0x1ad   : > { %501 = vmatpush3.bf16.msra.mxu1 %v254_v58 }
 0x1ae   : > { %502 = vmatprep.subr.bf16.mxu1 %v743_v2 }
 0x1b1   : > { %503 = vmatpush3.bf16.msra.mxu1 %v255_v59 }
 0x1b2   : > { %504 = vmatprep.subr.bf16.mxu1 %v743_v2 }
 0x1b5   : > { %505 = vmatpush3.bf16.msra.mxu1 %v256_v60 }
 0x1b6   : > { %506 = vmatprep.subr.bf16.mxu1 %v743_v2 }
 0x1b9   : > { %507 = vmatpush3.bf16.msra.mxu1 %v257_v61 }
 0x1ba   : > { %508 = vmatprep.subr.bf16.mxu1 %v743_v2 }
 0x1bd   : > { %509 = vmatpush3.bf16.msra.mxu1 %v258_v62 }
 0x1c0   : > { %511 = vmatmul.mubr.bf16.vlgmr.msra.gmra.mrb[0].mxu1 %v259_v63 }
 0x293   : > { %v294_v0 = vpop.f32.mrb[0].mxu1 }
 0x294   : > { %v512_v1 = vpop.f32.mrb[1].mxu1  ;;  %v309_v4 = vmul.f32 %v294_v0, %v294_v0 }
 0x295   : > { %v297_v3 = vpop.f32.mrb[2].mxu1 }
 0x296   : > { %v301_v5 = vadd.f32 %v297_v3, %v294_v0  ;;  %v310_v6 = vmul.f32 %v297_v3, %v297_v3  ;;  %v513_v7 = vpop.f32.mrb[3].mxu1 }
 0x298   : > { %v302_v8 = vrot.slane %v301_v5, 4  ;;  %v311_v9 = vadd.f32 %v310_v6, %v309_v4 }
 0x29a   : > { %v303_v10 = vadd.f32 %v302_v8, %v301_v5  ;;  %v312_v11 = vrot.slane %v311_v9, 4 }
 0x29c   : > { %v304_v12 = vrot.slane %v303_v10, 2  ;;  %v313_v13 = vadd.f32 %v312_v11, %v311_v9 }
 0x29e   : > { %v305_v14 = vadd.f32 %v304_v12, %v303_v10  ;;  %v314_v2 = vrot.slane %v313_v13, 2 }
 0x2a0   : > { %v306_v15 = vrot.slane %v305_v14, 1  ;;  %v315_v16 = vadd.f32 %v314_v2, %v313_v13 }
 0x2a2   : > { %v307_v17 = vadd.f32 %v306_v15, %v305_v14  ;;  %v316_v18 = vrot.slane %v315_v16, 1 }
 0x2a4   : > { %v308_v19 = vmul.f32 0.0625, %v307_v17  ;;  %v317_v20 = vadd.f32 %v316_v18, %v315_v16 }
 0x2a6   : > { %v318_v21 = vmul.f32 0.0625, %v317_v20  ;;  %v319_v22 = vmul.f32 %v308_v19, %v308_v19 }
 0x2a8   : > { %v320_v23 = vsub.f32 %v318_v21, %v319_v22 }
 0x2aa   : > { %v321_v24 = vmax.f32 %v320_v23, 0.0 }
 0x2ac   : > { %v324_v25 = vadd.f32 1e-05, %v321_v24 }
 0x2ae   : > { %556 = vrsqrt.f32 %v324_v25 }
 0x2b8   : > { %v557_v27 = vpop.eup %556 }
 0x2b9   : > { %v326_v28 = vmul.f32 %v557_v27, %v445_v26 }
 0x2bb   : > { %v329_v30 = vmul.f32 %v326_v28, %v308_v19  ;;  %v335_v31 = vrot.slane %v326_v28, %v915_v41 }
 0x2bd   : > { %v330_v32 = vsub.f32 %v447_v29, %v329_v30  ;;  %v337_v33 = vmul.f32 %v335_v31, %v294_v0  ;;  %v338_v34 = vmul.f32 %v335_v31, %v297_v3 }
 0x2bf   : > { %v343_v35 = vrot.slane %v330_v32, %v915_v41  ;;  %62 = sbr.rel (!%p60_p0) target bundleno = 59 (0x3b), region = 82 }
 0x2c1   : > { %v345_v36 = vadd.f32 %v343_v35, %v337_v33  ;;  %v346_v37 = vadd.f32 %v343_v35, %v338_v34 }
 0x2c3   : > { %v347_v38 = vmax.f32 %v345_v36, 0.0   ;;  %v348_v39 = vmax.f32 %v346_v37, 0.0  }
 0x2c5   : > { %v1000_v1 = vmov %v348_v39  ;;  %v1001_v0 = vmov %v347_v38  ;;  %349 = vst [vmem:[#allocation9] sm:$0xff] (%p60_p0), %v347_v38  ;;  %350 = vst [vmem:[#allocation9 + $0x8] sm:$0xff] (%p60_p0), %v348_v39 }
 0x2c6   :  { %693 = shalt.err (!%p690_p13)
}
 0x2c7   :  { %s694_s0 = scalar_lea.hbm %s997_s4, 256 }
 0x2c8   :  { %p695_p2 = scmp.ne.s32.totalorder %s997_s4, %s694_s0  ;;  %p698_p3 = scmp.lt.u32.totalorder %s694_s0, %s997_s4 }
 0x2ca   :  { %p700_p5 = pnand %p698_p3, %p695_p2 }
 0x2cc   :  { %703 = shalt.err (!%p700_p5)
}
 0x2cd   :  { %s746_s3 = smov 128   ;;  %s747_s26 = smov 8  }
 0x2ce   :  { %362 = dma.vmem_to_hbm [thread:$0]  %s357_s22, 256, %s997_s4, [#allocation6], %s746_s3, %s746_s3, %s747_s26  }
 0x2cf   :  { %724 = dma.done.wait [#allocation6], 256  }
 0x2d0   :  { %725 = vsyncadd [#allocation6], 4294967040 }
 0x2d1   :  { %366 = vsyncpa [#allocation5], 1 }
 0x2d2   :  { %367 = vsyncpa [#allocation8], 1 }
 0x2d3   :  { %368 = vsyncpa [#allocation6], 1 }
 0x2d4   :  { %369 = vsyncmov [#allocation3] }
 0x2d7   :  { %s370_s12 = vpop.sfrf %369 }
 0x2d8   :  { %p448_p4 = scmp.ne.s32.totalorder %s370_s12, 0 }
 0x2da   :  { %374 = shalt.err (%p448_p4)  }
 0x2db   :  { %376 = vsyncmov [#allocation3 + $0x1] }
 0x2de   :  { %s377_s2 = vpop.sfrf %376 }
 0x2df   :  { %p449_p6 = scmp.ne.s32.totalorder %s377_s2, 0 }
 0x2e1   :  { %381 = shalt.err (%p449_p6)  }

</bundles_post_ra>
